<compile_context>
chip_gen: v7x
topology: tpu7x:2x2x1
jax: 0.10.0
libtpu: 0.0.40
codegen_flags: <defaults>
</compile_context>

<pallas_src>
import math
import functools

import jax
import jax.numpy as jnp
from jax.experimental import pallas as pl
from jax.experimental.pallas import tpu as pltpu


def build_positional_encoding_table(seq_len: int, d_model: int) -> jax.Array:
    """Builds the (seq_len, d_model) sin/cos buffer exactly like the PyTorch module."""
    assert d_model % 2 == 0, "d_model must be even (matches the PyTorch buffer layout)"
    position = jnp.arange(seq_len, dtype=jnp.float32)[:, None]                  # (S, 1)
    div_term = jnp.exp(
        jnp.arange(0, d_model, 2, dtype=jnp.float32) * (-math.log(10000.0) / d_model)
    )                                                                           # (D/2,)
    angles = position * div_term                                                # (S, D/2)
    pe = jnp.zeros((seq_len, d_model), dtype=jnp.float32)
    pe = pe.at[:, 0::2].set(jnp.sin(angles))
    pe = pe.at[:, 1::2].set(jnp.cos(angles))
    return pe


# ----------------------------------------------------------------------------- kernels
def _pos_enc_kernel(x_ref, pe_ref, out_ref):
    # x_ref/out_ref: (b_blk, tile_s, D); pe_ref: (tile_s, D)
    y = x_ref[...] + pe_ref[...][None].astype(x_ref.dtype)
    out_ref[...] = y.astype(out_ref.dtype)


def _pos_enc_dropout_kernel(x_ref, pe_ref, u_ref, out_ref, *, rate: float):
    # u_ref: (b_blk, tile_s, D) uniform [0,1) randoms generated host-side.
    y = x_ref[...] + pe_ref[...][None].astype(x_ref.dtype)
    keep = u_ref[...] >= jnp.float32(rate)
    inv_keep = jnp.float32(1.0 / (1.0 - rate))
    out_ref[...] = (jnp.where(keep, y, jnp.zeros_like(y)) * inv_keep).astype(out_ref.dtype)


# ----------------------------------------------------------------------------- tiling
def _choose_tiles(batch: int, seq_len: int, d_model: int, n_streams: int):
    """Pick (tile_s, b_blk) targeting ~1-4 MiB blocks and <=~24 MiB live VMEM.

    n_streams = number of distinct arrays streamed per step (x, pe, out[, u]);
    each is double-buffered by the Pallas pipeline.
    """
    row_bytes = d_model * 4  # f32
    vmem_budget = 24 * 1024 * 1024                    # safe on v7x (64 MiB phys)
    per_block = min(4 * 1024 * 1024, vmem_budget // (2 * n_streams))
    per_block = max(per_block, 8 * row_bytes)         # always allow >= 8 rows

    max_rows = max(8, per_block // row_bytes)
    if max_rows >= seq_len:
        tile_s = seq_len                              # full-extent block (alignment waived)
    else:
        tile_s = max(8, (max_rows // 8) * 8)          # 8-sublane aligned

    # Fold batch rows into the block only when the whole sequence fits in one tile,
    # so the seq grid axis (and the pe-residency trick) is unaffected otherwise.
    b_blk = 1
    if tile_s >= seq_len:
        b_blk = max(1, min(batch, per_block // max(1, tile_s * row_bytes)))

    # v7x has 2 TensorCores sharing the grid: make sure there are >= 2 steps if possible.
    for _ in range(16):
        steps = pl.cdiv(seq_len, tile_s) * pl.cdiv(batch, b_blk)
        if steps >= 2:
            break
        if b_blk > 1:
            b_blk = max(1, b_blk // 2)
        elif seq_len > 8 and tile_s > 8:
            tile_s = max(8, ((tile_s // 2) // 8) * 8)
        else:
            break
    return tile_s, b_blk


# ----------------------------------------------------------------------------- wrapper
def positional_encoding(
    x: jax.Array,
    pe: jax.Array,
    *,
    dropout_rate: float = 0.0,
    training: bool = False,
    rng: jax.Array | None = None,
) -> jax.Array:
    """x: (batch, seq_len, d_model); pe: (pe_len, d_model) with pe_len >= seq_len.

    Returns Dropout(x + pe[:seq_len]) with PyTorch nn.Dropout semantics
    (identity when training=False or dropout_rate == 0).
    """
    batch, seq_len, d_model = x.shape
    pe_len, d_pe = pe.shape
    assert d_pe == d_model, "pe last dim must equal d_model"
    assert seq_len <= pe_len, "sequence longer than the positional-encoding buffer"

    apply_dropout = bool(training) and float(dropout_rate) > 0.0
    n_streams = 4 if apply_dropout else 3
    tile_s, b_blk = _choose_tiles(batch, seq_len, d_model, n_streams)

    # Grid: sequence tiles OUTER, batch blocks INNER -> the pe block index (s, 0)
    # is constant across consecutive steps, so Pallas keeps the pe tile resident.
    grid = (pl.cdiv(seq_len, tile_s), pl.cdiv(batch, b_blk))

    x_spec = pl.BlockSpec((b_blk, tile_s, d_model), lambda s, b: (b, s, 0))
    pe_spec = pl.BlockSpec((tile_s, d_model), lambda s, b: (s, 0))

    compiler_params = pltpu.CompilerParams(
        dimension_semantics=("parallel", "parallel"),
        vmem_limit_bytes=32 * 1024 * 1024,
    )
    out_shape = jax.ShapeDtypeStruct((batch, seq_len, d_model), x.dtype)

    if not apply_dropout:
        return pl.pallas_call(
            _pos_enc_kernel,
            out_shape=out_shape,
            grid=grid,
            in_specs=[x_spec, pe_spec],
            out_specs=x_spec,
            compiler_params=compiler_params,
        )(x, pe)

    if rng is None:
        rng = jax.random.PRNGKey(0)
    # Host-side uniform randoms (portable; see TODO about the TPU hardware PRNG).
    u = jax.random.uniform(rng, x.shape, dtype=jnp.float32)
    kernel = functools.partial(_pos_enc_dropout_kernel, rate=float(dropout_rate))
    return pl.pallas_call(
        kernel,
        out_shape=out_shape,
        grid=grid,
        in_specs=[x_spec, pe_spec, x_spec],
        out_specs=x_spec,
        compiler_params=compiler_params,
    )(x, pe, u)


# ----------------------------------------------------------------------------- test
if __name__ == "__main__":
    d_model = 128     # lane-dense last dim
    seq_len = 16
    pe_len = 32       # buffer longer than the sequence (exercises the no-slice path)
    batch = 2
    dropout = 0.1

    key = jax.random.PRNGKey(0)
    x = jax.random.normal(key, (batch, seq_len, d_model), dtype=jnp.float32)
    pe = build_positional_encoding_table(pe_len, d_model)

    # --- Eval mode (dropout is identity): must match the pure-JAX reference.
    out_eval = positional_encoding(x, pe, dropout_rate=dropout, training=False)
    out_eval = jax.block_until_ready(out_eval)

    ref_eval = x + pe[None, :seq_len, :]
    assert out_eval.shape == (batch, seq_len, d_model)
    assert jnp.allclose(out_eval, ref_eval, atol=1e-5, rtol=1e-5)

    # --- Training mode: kept elements equal (x + pe) / (1 - p); dropped are zero.
    drop_key = jax.random.PRNGKey(123)
    out_train = positional_encoding(
        x, pe, dropout_rate=dropout, training=True, rng=drop_key
    )
    out_train = jax.block_until_ready(out_train)
    assert out_train.shape == (batch, seq_len, d_model)

    u_ref = jax.random.uniform(drop_key, x.shape, dtype=jnp.float32)
    keep_ref = u_ref >= dropout
    ref_train = jnp.where(keep_ref, ref_eval, 0.0) * jnp.float32(1.0 / (1.0 - dropout))
    assert jnp.allclose(out_train, ref_train, atol=1e-5, rtol=1e-5)

    print("KERNEL_OK")
</pallas_src>

<mosaic_0001>
module attributes {stable_mosaic.version = 11 : i64} {
  func.func @_pos_enc_kernel(%arg0: i32, %arg1: i32, %arg2: memref<1x16x128xf32, #tpu.memory_space<vmem>>, %arg3: memref<16x128xf32, #tpu.memory_space<vmem>>, %arg4: memref<1x16x128xf32, #tpu.memory_space<vmem>>) attributes {dimension_semantics = [#tpu.dimension_semantics<parallel>, #tpu.dimension_semantics<parallel>], iteration_bounds = array<i64: 1, 2>, scalar_prefetch = 0 : i64, scratch_operands = 0 : i64, tpu.core_type = #tpu.core_type<tc>, window_params = [{transform_indices = @transform_0, window_bounds = array<i64: 1, 16, 128>}, {transform_indices = @transform_1, window_bounds = array<i64: 16, 128>}, {transform_indices = @transform_2, window_bounds = array<i64: 1, 16, 128>}]} {
    %c0 = arith.constant 0 : index
    %c0_0 = arith.constant 0 : index
    %c0_1 = arith.constant 0 : index
    %0 = vector.load %arg2[%c0, %c0_0, %c0_1] : memref<1x16x128xf32, #tpu.memory_space<vmem>>, vector<1x16x128xf32>
    %c0_2 = arith.constant 0 : index
    %c0_3 = arith.constant 0 : index
    %1 = vector.load %arg3[%c0_2, %c0_3] : memref<16x128xf32, #tpu.memory_space<vmem>>, vector<16x128xf32>
    %2 = vector.shape_cast %1 : vector<16x128xf32> to vector<1x16x128xf32>
    %3 = arith.addf %0, %2 : vector<1x16x128xf32>
    %c0_4 = arith.constant 0 : index
    %c0_5 = arith.constant 0 : index
    %c0_6 = arith.constant 0 : index
    %4 = vector.load %arg4[%c0_4, %c0_5, %c0_6] : memref<1x16x128xf32, #tpu.memory_space<vmem>>, vector<1x16x128xf32>
    tpu.vector_store %arg4[%c0_4, %c0_5, %c0_6], %3 {strides = array<i32>} : memref<1x16x128xf32, #tpu.memory_space<vmem>>, vector<1x16x128xf32>,
    return
  }
  func.func @transform_0(%arg0: i32, %arg1: i32) -> (i32, i32, i32) {
    %c0_i32 = arith.constant 0 : i32
    %c0_i32_0 = arith.constant 0 : i32
    return %arg1, %arg0, %c0_i32 : i32, i32, i32
  }
  func.func @transform_1(%arg0: i32, %arg1: i32) -> (i32, i32) {
    %c0_i32 = arith.constant 0 : i32
    %c0_i32_0 = arith.constant 0 : i32
    return %arg0, %c0_i32 : i32, i32
  }
  func.func @transform_2(%arg0: i32, %arg1: i32) -> (i32, i32, i32) {
    %c0_i32 = arith.constant 0 : i32
    %c0_i32_0 = arith.constant 0 : i32
    return %arg1, %arg0, %c0_i32 : i32, i32, i32
  }
}

</mosaic_0001>

<bundles_post_ra>
// kernel: tpu_custom_call.1
= control target key start
LH: loop header
LB: loop body
LE: loop exit
PB: predicated region body
PF: predicated region fallthrough
CT: control target
= control target key end

     0   :  { %7 = vsyncpa [#allocation3], 0  ;;  %s828_s0 = inlined_call_operand.hbm [shape: f32[2,16,128], index: 0, kind: input, shape index: {}]   ;;  %s829_s1 = inlined_call_operand.hbm [shape: f32[32,128], index: 1, kind: input, shape index: {}]   ;;  %s830_s2 = inlined_call_operand.hbm [shape: f32[2,16,128], index: 2, kind: output, shape index: {}]  }
   0x1   :  { %9 = vsyncpa [#allocation3 + $0x1], 0 }
   0x2   :  { %10 = vsyncpa [#allocation6], 0 }
   0x3   :  { %11 = vsyncpa [#allocation4], 0 }
   0x4   :  { %13 = vsyncpa [#allocation4 + $0x1], 0  ;;  %s593_s9 = smov 0   ;;  %s595_s10 = smov 0  }
   0x5   :  { %s597_s11 = smov 0   ;;  %s599_s12 = smov 0  }
   0x6   :  { %s601_s13 = smov 0   ;;  %s603_s14 = smov 0  }
   0x7 LB: > { %s329_s15 = sadd.s32 4294967295, %s569_s14   ;;  %s330_s16 = sadd.s32 4294967294, %s569_s14   ;;  %s569_s14 = sphi %s603_s14, %s19_s14   ;;  %s565_s13 = sphi %s601_s13, %s854_s13   ;;  %s561_s12 = sphi %s599_s12, %s853_s12   ;;  %s557_s11 = sphi %s597_s11, %s852_s11   ;;  %s553_s10 = sphi %s595_s10, %s851_s10   ;;  %s549_s9 = sphi %s593_s9, %s850_s9  }
   0x8   : > { %p53_p0 = scmp.ne.s32.totalorder %s553_s10, %s549_s9  ;;  %p627_p1 = scmp.eq.s32.totalorder %s329_s15, 0 }
   0x9   : > { %p631_p2 = scmp.eq.s32.totalorder %s329_s15, 1  ;;  %p111_p3 = scmp.eq.s32.totalorder %s330_s16, 1 }
   0xa   : > { %s835_s17 = scalar_select %p627_p1, 1, 0 }
   0xb   : > { %s836_s18 = scalar_select %p631_p2, 1, 0 }
   0xc   : > { %p637_p4 = por %p627_p1, %p53_p0  ;;  %p331_p5 = scmp.ge.s32.totalorder %s569_s14, 1 }
   0xd   : > { %p642_p6 = por %p111_p3, %p53_p0  ;;  %p118_p7 = scmp.lt.s32.totalorder %s569_s14, 3 }
   0xe   : > { %s837_s19 = scalar_select %p637_p4, 1, 0 }
   0xf   : > { %s838_s20 = scalar_select %p642_p6, 1, 0 }
  0x10   : > { %p647_p8 = pnand %p331_p5, %p118_p7  ;;  %s571_s22 = smov [#allocation5]  }
  0x11   : > { %s133_s23 = sshll.u32 %s571_s22, 4  ;;  %s28_s25 = sadd.s32 1, %s565_s13  ;;  %s651_s23 = int_to_ptr.vmem [resolvable:$true] %s133_s23 }
  0x12   : > { %s839_s21 = scalar_select %p647_p8, 1, 0 }
  0x13   : > { %p356_p9 = pneg %p647_p8  ;;  %s425_s28 = scalar_lea.hbm %s829_s1, 256 }
  0x14   : > { %p426_p12 = scmp.ne.s32.totalorder %s829_s1, %s425_s28  ;;  %s430_s5 = scalar_lea.hbm %s829_s1, 512 }
  0x15   : > { %p658_p11 = pnand %p356_p9, %p627_p1  ;;  %p431_p5 = scmp.lt.u32.totalorder %s430_s5, %s425_s28 }
  0x16   : > { %p432_p7 = scmp.lt.u32.totalorder %s425_s28, %s829_s1 }
  0x17   : > { %p427_p13 = pneg %p658_p11 }
  0x18   : > { %p433_p9 = por %p432_p7, %p431_p5 }
  0x19   : > { %p428_p0 = pnand %p427_p13, %p426_p12 }
  0x1b   : > { %p429_p3 = pneg %p428_p0 }
  0x1d   : > { %p434_p10 = pnand %p433_p9, %p429_p3 }
  0x1f   : > { %437 = shalt.err (!%p434_p10)
}
  0x20   : > { %s438_s8 = scalar_lea.vmem %s651_s23, 256  ;;  %p446_p0 = scmp.lt.s32.totalorder %s651_s23, %s651_s23 }
  0x21   : > { %p439_p6 = scmp.ne.s32.totalorder %s651_s23, %s438_s8  ;;  %p447_p4 = scmp.lt.s32.totalorder %s438_s8, %s438_s8 }
  0x23   : > { %p441_p1 = pnand %p439_p6, %p427_p13  ;;  %p448_p8 = por %p447_p4, %p446_p0 }
  0x25   : > { %p442_p12 = pneg %p441_p1 }
  0x27   : > { %p449_p2 = pnand %p448_p8, %p442_p12 }
  0x29   : > { %452 = shalt.err (!%p449_p2)
}
  0x2a   : > { %s572_s15 = smov 128   ;;  %s573_s16 = smov 8  }
  0x2b   : > { %359 = dma.hbm_to_vmem [thread:$0]  (!%p658_p11), %s829_s1, 256, %s651_s23, [#allocation6], %s572_s15, %s572_s15, %s573_s16  }
  0x2c   : > { %p29_p1 = scmp.ge.s32.totalorder %s28_s25, 2  ;;  %s40_s27 = sadd.s32 1, %s557_s11 }
  0x2d   : > { %p47_p2 = scmp.ne.s32.totalorder %s557_s11, %s553_s10  ;;  %p48_p4 = scmp.eq.s32.totalorder %s569_s14, 0 }
  0x2e   : > { %s856_s25 = smov (%p29_p1, %s28_s25), 0  ;;  %p842_p8 = scmp.ne.s32.totalorder %s836_s18, 0 }
  0x2f   : > { %p696_p6 = por %p48_p4, %p47_p2  ;;  %s35_s29 = ssub.s32 %s565_s13, %s856_s25 }
  0x30   : > { %p702_p10 = por %p842_p8, %p47_p2  ;;  %p369_p13 = scmp.lt.s32.totalorder %s569_s14, 2 }
  0x31   : > { %p38_p11 = scmp.eq.s32.totalorder %s35_s29, 0  ;;  %s147_s23 = sand.u32 1, %s557_s11  }
  0x32   : > { %s334_s30 = sshll.u32 %s147_s23, 4  ;;  %s346_s4 = sshll.u32 %s565_s13, 8 }
  0x33   : > { %s711_s3 = scalar_select %p38_p11, %s557_s11, %s40_s27  }
  0x34   : > { %s717_s7 = scalar_lea.hbm %s828_s0, %s346_s4  ;;  %s151_s18 = scalar_lea.vmem [#allocation2], %s334_s30 }
  0x35   : > { %s160_s8 = sshll.u32 %s151_s18, 4  ;;  %p723_p3 = pnand %p369_p13, %p696_p6  ;;  %s719_s8 = int_to_ptr.vmem [resolvable:$true] %s160_s8 }
  0x36   : > { %s727_s26 = scalar_lea.sflag [#allocation3], %s147_s23  ;;  %s453_s27 = scalar_lea.hbm %s717_s7, 256 }
  0x37   : > { %p454_p5 = scmp.ne.s32.totalorder %s717_s7, %s453_s27  ;;  %p455_p7 = pneg %p723_p3 }
  0x38   : > { %s458_s28 = scalar_lea.hbm %s828_s0, 512  ;;  %p459_p0 = scmp.lt.u32.totalorder %s717_s7, %s828_s0 }
  0x39   : > { %p456_p9 = pnand %p455_p7, %p454_p5  ;;  %p460_p1 = scmp.lt.u32.totalorder %s458_s28, %s453_s27 }
  0x3a   : > { %p462_p4 = scmp.lt.u32.totalorder %s453_s27, %s717_s7 }
  0x3b   : > { %p457_p12 = pneg %p456_p9  ;;  %p461_p2 = por %p460_p1, %p459_p0 }
  0x3d   : > { %p463_p6 = por %p462_p4, %p461_p2 }
  0x3f   : > { %p464_p8 = pnand %p463_p6, %p457_p12 }
  0x41   : > { %467 = shalt.err (!%p464_p8)
}
  0x42   : > { %s468_s23 = scalar_lea.vmem %s719_s8, 256  ;;  %s574_s6 = smov [#allocation2]  }
  0x43   : > { %p469_p13 = scmp.ne.s32.totalorder %s719_s8, %s468_s23  ;;  %s473_s18 = sshll.u32 %s574_s6, 4  ;;  %s474_s18 = int_to_ptr.vmem [resolvable:$false] %s473_s18 }
  0x44   : > { %s475_s29 = scalar_lea.vmem %s474_s18, 512  ;;  %p476_p9 = scmp.lt.s32.totalorder %s719_s8, %s474_s18 }
  0x45   : > { %p471_p11 = pnand %p469_p13, %p455_p7  ;;  %p477_p0 = scmp.lt.s32.totalorder %s475_s29, %s468_s23 }
  0x47   : > { %p472_p5 = pneg %p471_p11  ;;  %p478_p1 = por %p477_p0, %p476_p9 }
  0x49   : > { %p479_p2 = pnand %p478_p1, %p472_p5 }
  0x4b   : > { %482 = shalt.err (!%p479_p2)
}
  0x4c   : > { %363 = dma.hbm_to_vmem [thread:$0]  (!%p723_p3), %s717_s7, 256, %s719_s8, %s727_s26, %s572_s15, %s572_s15, %s573_s16  }
  0x4d   : > { %p845_p7 = scmp.ne.s32.totalorder %s839_s21, 0 }
  0x4e   : > { %s761_s27 = sand.u32 (!%p845_p7), 1, %s553_s10   ;;  %p846_p12 = scmp.ne.s32.totalorder (!%p845_p7), %s837_s19, 0 }
  0x4f   : > { %172 = sbr.rel (%p845_p7) target bundleno = 116 (0x74), region = 28  ;;  %s338_s30 = sshll.u32 (!%p845_p7), %s761_s27, 4 }
  0x50   : > { %s175_s28 = scalar_lea.sflag (!%p845_p7), [#allocation3], %s761_s27  ;;  %s178_s4 = scalar_lea.vmem (!%p845_p7), [#allocation2], %s338_s30 }
  0x56   : > { %536 = dma.done.wait (%p846_p12), %s175_s28, 256  }
  0x57   : > { %538 = vsyncadd (%p846_p12), %s175_s28, 4294967040  ;;  %p847_p4 = scmp.ne.s32.totalorder %s835_s17, 0 }
  0x59   : > { %540 = dma.done.wait (%p847_p4), [#allocation6], 256  }
  0x5a   : > { %542 = vsyncadd (%p847_p4), [#allocation6], 4294967040  ;;  %s202_s21 = scalar_lea.vmem [#allocation7], %s338_s30  ;;  %s347_s16 = sshll.u32 %s561_s12, 8  ;;  %v206_v0 = vld [vmem:[%s178_s4] sm:$0xff]  ;;  %v207_v2 = vld [vmem:[%s178_s4 + $0x8] sm:$0xff] }
  0x5b   : > { %s230_s15 = sshll.u32 %s202_s21, 4  ;;  %v208_v1 = vld [vmem:[#allocation5] sm:$0xff]  ;;  %v209_v4 = vld [vmem:[#allocation5 + $0x8] sm:$0xff]  ;;  %s779_s17 = scalar_lea.hbm %s830_s2, %s347_s16  ;;  %s774_s15 = int_to_ptr.vmem [resolvable:$true] %s230_s15 }
  0x5c   : > { %v210_v3 = vadd.f32 %v208_v1, %v206_v0  ;;  %v211_v5 = vadd.f32 %v209_v4, %v207_v2  ;;  %s215_s8 = scalar_lea.sflag [#allocation4], %s761_s27  ;;  %s483_s12 = scalar_lea.vmem %s774_s15, 256 }
  0x5d   : > { %p484_p3 = scmp.ne.s32.totalorder %s774_s15, %s483_s12  ;;  %s575_s22 = smov [#allocation7]  }
  0x5e   : > { %212 = vst [vmem:[%s202_s21] sm:$0xff] %v210_v3  ;;  %213 = vst [vmem:[%s202_s21 + $0x8] sm:$0xff] %v211_v5  ;;  %s487_s26 = sshll.u32 %s575_s22, 4  ;;  %s488_s26 = int_to_ptr.vmem [resolvable:$false] %s487_s26 }
  0x5f   : > { %p485_p6 = pnand %p484_p3, %p702_p10  ;;  %s489_s5 = scalar_lea.vmem %s488_s26, 512 }
  0x60   : > { %p490_p13 = scmp.lt.s32.totalorder %s774_s15, %s488_s26  ;;  %p491_p11 = scmp.lt.s32.totalorder %s489_s5, %s483_s12 }
  0x61   : > { %p486_p8 = pneg %p485_p6 }
  0x62   : > { %p492_p5 = por %p491_p11, %p490_p13 }
  0x64   : > { %p493_p9 = pnand %p492_p5, %p486_p8 }
  0x66   : > { %496 = shalt.err (!%p493_p9)
}
  0x67   : > { %s497_s23 = scalar_lea.hbm %s779_s17, 256  ;;  %s501_s29 = scalar_lea.hbm %s830_s2, 512 }
  0x68   : > { %p498_p0 = scmp.ne.s32.totalorder %s779_s17, %s497_s23  ;;  %p502_p7 = scmp.lt.u32.totalorder %s779_s17, %s830_s2 }
  0x69   : > { %p503_p12 = scmp.lt.u32.totalorder %s501_s29, %s497_s23  ;;  %p505_p3 = scmp.lt.u32.totalorder %s497_s23, %s779_s17 }
  0x6a   : > { %p499_p1 = pnand %p498_p0, %p702_p10 }
  0x6b   : > { %p504_p4 = por %p503_p12, %p502_p7 }
  0x6c   : > { %p500_p2 = pneg %p499_p1 }
  0x6d   : > { %p506_p6 = por %p505_p3, %p504_p4 }
  0x6f   : > { %p507_p8 = pnand %p506_p6, %p500_p2 }
  0x71   : > { %510 = shalt.err (!%p507_p8)
}
  0x72   : > { %s576_s4 = smov 128   ;;  %s577_s21 = smov 8  }
  0x73   : > { %354 = dma.vmem_to_hbm [thread:$0]  (%p702_p10), %s774_s15, 256, %s779_s17, %s215_s8, %s576_s4, %s576_s4, %s577_s21  }
  0x74 PF: > { %s245_s16 = sand.u32 1, %s549_s9   ;;  %p848_p13 = scmp.ne.s32.totalorder %s838_s20, 0 }
  0x75   : > { %p849_p11 = scmp.ge.s32.totalorder %s569_s14, 2  ;;  %s246_s19 = scalar_lea.sflag [#allocation4], %s245_s16 }
  0x77   : > { %p365_p5 = pnand %p849_p11, %p848_p13 }
  0x79   : > { %544 = dma.done.wait (!%p365_p5), %s246_s19, 256  }
  0x7a   : > { %546 = vsyncadd (!%p365_p5), %s246_s19, 4294967040  ;;  %s19_s14 = sadd.s32 1, %s569_s14   ;;  %s850_s9 = smov %s553_s10 }
  0x7b   : > { %p16_p9 = scmp.ge.s32.totalorder %s19_s14, 4   ;;  %s851_s10 = smov %s557_s11 }
  0x7c   : > { %s852_s11 = smov %s711_s3  ;;  %s853_s12 = smov %s565_s13 }
  0x7d   : > { %s854_s13 = smov %s856_s25  ;;  %18 = sbr.rel (!%p16_p9) target bundleno = 7 (0x7), region = 78 }
  0x84   :  { %251 = vsyncpa [#allocation3], 1 }
  0x85   :  { %253 = vsyncpa [#allocation3 + $0x1], 1 }
  0x86   :  { %254 = vsyncpa [#allocation6], 1 }
  0x87   :  { %255 = vsyncpa [#allocation4], 1 }
  0x88   :  { %257 = vsyncpa [#allocation4 + $0x1], 1 }

</bundles_post_ra>
